<compile_context>
chip_gen: v6e
topology: v6e:2x2x1
jax: 0.10.0
libtpu: 0.0.40
codegen_flags: <defaults>
</compile_context>

<pallas_src>
import functools

import jax
import jax.numpy as jnp
from jax.experimental import pallas as pl
from jax.experimental.pallas import tpu as pltpu


def _round_up(a: int, m: int) -> int:
    return (a + m - 1) // m * m


def _pick_tile_b(B: int, max_tile: int = 128) -> int:
    """Largest multiple-of-8 batch tile <= max_tile that minimizes padded rows.

    For batches above 16 the tile is capped at ceil(B/2) so the grid has at
    least 2 steps (megacore / v7x second-TensorCore utilization)."""
    B8 = _round_up(B, 8)
    if B8 <= 16:
        return B8
    cap = min(max_tile, max(8, _round_up(B8 // 2, 8)))
    best_t, best_pad = 8, None
    for t in range(8, cap + 1, 8):
        pad = _round_up(B, t) - B
        if best_pad is None or pad < best_pad or (pad == best_pad and t > best_t):
            best_t, best_pad = t, pad
    return best_t


def _mlp_kernel(x_ref, w1_ref, b1_ref, w2_ref, b2_ref, o_ref, *, h_chunk):
    """Fused Linear -> ReLU -> Linear on one (tile_b, K_pad) activation tile.

    The H (hidden) reduction of the second matmul is tiled in h_chunk slices so
    the f32 ReLU intermediate never exceeds (tile_b, h_chunk)."""
    x = x_ref[...]                                       # (tile_b, K_pad) bf16
    H = w1_ref.shape[1]
    acc = jnp.zeros(o_ref.shape, jnp.float32)            # (tile_b, C_pad) f32
    for hk in range(0, H, h_chunk):                      # static unrolled loop
        # First linear chunk: bf16 x bf16 -> f32 on the MXU.
        h = jnp.dot(x, w1_ref[:, hk:hk + h_chunk],
                    preferred_element_type=jnp.float32)
        # Bias + ReLU on the VPU (f32), then back to bf16 for the second MXU pass.
        h = jnp.maximum(h + b1_ref[:, hk:hk + h_chunk], 0.0)
        acc = acc + jnp.dot(h.astype(jnp.bfloat16), w2_ref[hk:hk + h_chunk, :],
                            preferred_element_type=jnp.float32)
    o_ref[...] = (acc + b2_ref[...]).astype(o_ref.dtype)


def make_linear_softmax(w1, b1, w2, b2, *, h_chunk=256):
    """One-time weight preparation + jitted forward closure.

    w1: (F_in, H)  (PyTorch weight.T layout)   b1: (H,)
    w2: (H, C)     (PyTorch weight.T layout)   b2: (C,)
    Returns forward(x: (B, F_in) f32) -> (B, C) f32 logits.
    """
    F_in, H = w1.shape
    C = w2.shape[1]
    K_pad = _round_up(F_in, 128)          # 100 -> 128 (exact MXU K slab)
    C_pad = _round_up(C, 128)             # 75  -> 128 (lane-dense output)
    hc = h_chunk if H % h_chunk == 0 else H

    # --- one-time: pad + cast weights (NOT in the per-call hot path) ---------
    w1p = jnp.pad(w1, ((0, K_pad - F_in), (0, 0))).astype(jnp.bfloat16)
    b1p = b1.reshape(1, H).astype(jnp.float32)
    w2p = jnp.pad(w2, ((0, 0), (0, C_pad - C))).astype(jnp.bfloat16)
    b2p = jnp.pad(b2, (0, C_pad - C)).reshape(1, C_pad).astype(jnp.float32)
    w1p, b1p, w2p, b2p = jax.device_put((w1p, b1p, w2p, b2p))

    @jax.jit
    def _forward_impl(x, w1p, b1p, w2p, b2p):
        B = x.shape[0]
        tile_b = _pick_tile_b(B)
        B_pad = _round_up(B, tile_b)
        grid = (B_pad // tile_b,)

        # Per-call: pad batch + feature dims and stream activations as bf16.
        x_p = jnp.pad(x, ((0, B_pad - B), (0, K_pad - F_in))).astype(jnp.bfloat16)

        cost = pl.CostEstimate(
            flops=2 * B_pad * (K_pad * H + H * C_pad),
            transcendentals=0,
            bytes_accessed=(x_p.size * 2 + w1p.size * 2 + w2p.size * 2
                            + b1p.size * 4 + b2p.size * 4 + B_pad * C_pad * 4),
        )

        out_padded = pl.pallas_call(
            functools.partial(_mlp_kernel, h_chunk=hc),
            out_shape=jax.ShapeDtypeStruct((B_pad, C_pad), jnp.float32),
            grid=grid,
            in_specs=[
                pl.BlockSpec((tile_b, K_pad), lambda i: (i, 0)),  # x: streams
                pl.BlockSpec((K_pad, H), lambda i: (0, 0)),       # w1: resident
                pl.BlockSpec((1, H), lambda i: (0, 0)),           # b1
                pl.BlockSpec((H, C_pad), lambda i: (0, 0)),       # w2: resident
                pl.BlockSpec((1, C_pad), lambda i: (0, 0)),       # b2
            ],
            out_specs=pl.BlockSpec((tile_b, C_pad), lambda i: (i, 0)),
            compiler_params=pltpu.CompilerParams(
                dimension_semantics=("parallel",),
                vmem_limit_bytes=16 << 20,
            ),
            cost_estimate=cost,
        )(x_p, w1p, b1p, w2p, b2p)

        return out_padded[:B, :C]

    def forward(x):
        return _forward_impl(x, w1p, b1p, w2p, b2p)

    return forward


def init_params(key, input_feature=100, base_feature=1280, n_class=75,
                dtype=jnp.float32):
    """Deterministic init mimicking nn.Linear default (U(-1/sqrt(fan_in), +))."""
    k1, k2, k3, k4 = jax.random.split(key, 4)
    lim1 = 1.0 / jnp.sqrt(jnp.array(input_feature, dtype))
    lim2 = 1.0 / jnp.sqrt(jnp.array(base_feature, dtype))
    # Stored as (in_features, out_features) == PyTorch weight.T
    w1 = jax.random.uniform(k1, (input_feature, base_feature), dtype, -lim1, lim1)
    b1 = jax.random.uniform(k2, (base_feature,), dtype, -lim1, lim1)
    w2 = jax.random.uniform(k3, (base_feature, n_class), dtype, -lim2, lim2)
    b2 = jax.random.uniform(k4, (n_class,), dtype, -lim2, lim2)
    return w1, b1, w2, b2


if __name__ == "__main__":
    n_class = 75
    base_feature = 1280
    input_feature = 100
    batch = 8

    key = jax.random.PRNGKey(0)
    kx, kp = jax.random.split(key)
    x = jax.random.normal(kx, (batch, input_feature), jnp.float32)
    w1, b1, w2, b2 = init_params(kp, input_feature, base_feature, n_class)

    forward = make_linear_softmax(w1, b1, w2, b2)
    y = forward(x)
    y = jax.block_until_ready(y)
    assert y.shape == (batch, n_class)

    # Reference with bf16-cast operands (matches the kernel's MXU numerics).
    xb = x.astype(jnp.bfloat16).astype(jnp.float32)
    w1b = w1.astype(jnp.bfloat16).astype(jnp.float32)
    w2b = w2.astype(jnp.bfloat16).astype(jnp.float32)
    h_ref = jnp.maximum(xb @ w1b + b1, 0.0)
    ref_bf16 = h_ref.astype(jnp.bfloat16).astype(jnp.float32) @ w2b + b2
    assert jnp.allclose(y, ref_bf16, atol=2e-3, rtol=2e-3)

    # Sanity vs. full-f32 reference (looser tolerance due to bf16 operands).
    ref_f32 = jnp.maximum(x @ w1 + b1, 0.0) @ w2 + b2
    assert jnp.allclose(y, ref_f32, atol=5e-2, rtol=5e-2)

    # A second, larger batch exercises the multi-step (megacore-friendly) grid
    # and the minimal-padding tile_b selection.
    x2 = jax.random.normal(jax.random.PRNGKey(1), (260, input_feature), jnp.float32)
    y2 = jax.block_until_ready(forward(x2))
    ref2 = jnp.maximum(x2 @ w1 + b1, 0.0) @ w2 + b2
    assert y2.shape == (260, n_class)
    assert jnp.allclose(y2, ref2, atol=5e-2, rtol=5e-2)

    print("KERNEL_OK")
</pallas_src>

<mosaic_0001>
module attributes {stable_mosaic.version = 11 : i64} {
  func.func @_mlp_kernel(%arg0: i32, %arg1: memref<8x128xbf16, #tpu.memory_space<vmem>>, %arg2: memref<128x1280xbf16, #tpu.memory_space<vmem>>, %arg3: memref<1x1280xf32, #tpu.memory_space<vmem>>, %arg4: memref<1280x128xbf16, #tpu.memory_space<vmem>>, %arg5: memref<1x128xf32, #tpu.memory_space<vmem>>, %arg6: memref<8x128xf32, #tpu.memory_space<vmem>>) attributes {dimension_semantics = [#tpu.dimension_semantics<parallel>], iteration_bounds = array<i64: 1>, scalar_prefetch = 0 : i64, scratch_operands = 0 : i64, tpu.core_type = #tpu.core_type<tc>, window_params = [{transform_indices = @transform_0, window_bounds = array<i64: 8, 128>}, {pipeline_mode = #tpu.pipeline_mode<synchronous>, transform_indices = @transform_1, window_bounds = array<i64: 128, 1280>}, {pipeline_mode = #tpu.pipeline_mode<synchronous>, transform_indices = @transform_2, window_bounds = array<i64: 1, 1280>}, {pipeline_mode = #tpu.pipeline_mode<synchronous>, transform_indices = @transform_3, window_bounds = array<i64: 1280, 128>}, {pipeline_mode = #tpu.pipeline_mode<synchronous>, transform_indices = @transform_4, window_bounds = array<i64: 1, 128>}, {transform_indices = @transform_5, window_bounds = array<i64: 8, 128>}]} {
    %c0 = arith.constant 0 : index
    %c0_0 = arith.constant 0 : index
    %0 = vector.load %arg1[%c0, %c0_0] : memref<8x128xbf16, #tpu.memory_space<vmem>>, vector<8x128xbf16>
    %cst = arith.constant 0.000000e+00 : f32
    %1 = vector.broadcast %cst : f32 to vector<8x128xf32>
    %c0_1 = arith.constant 0 : index
    %c0_2 = arith.constant 0 : index
    %2 = vector.load %arg2[%c0_1, %c0_2] : memref<128x1280xbf16, #tpu.memory_space<vmem>>, vector<128x256xbf16>
    %cst_3 = arith.constant dense<0.000000e+00> : vector<8x256xf32>
    %3 = tpu.matmul %0, %2, %cst_3 {dimension_numbers = #tpu.dot_dimension_numbers<[1], [0], [0], [1], [0, 0, 1, 1], [], []>} : vector<8x128xbf16>, vector<128x256xbf16>, vector<8x256xf32> -> vector<8x256xf32>
    %c0_4 = arith.constant 0 : index
    %c0_5 = arith.constant 0 : index
    %4 = vector.load %arg3[%c0_4, %c0_5] : memref<1x1280xf32, #tpu.memory_space<vmem>>, vector<1x256xf32>
    %5 = vector.broadcast %4 : vector<1x256xf32> to vector<8x256xf32>
    %6 = arith.addf %3, %5 : vector<8x256xf32>
    %cst_6 = arith.constant 0.000000e+00 : f32
    %7 = vector.broadcast %cst_6 : f32 to vector<8x256xf32>
    %8 = arith.maximumf %6, %7 : vector<8x256xf32>
    %9 = arith.truncf %8 : vector<8x256xf32> to vector<8x256xbf16>
    %c0_7 = arith.constant 0 : index
    %c0_8 = arith.constant 0 : index
    %10 = vector.load %arg4[%c0_7, %c0_8] : memref<1280x128xbf16, #tpu.memory_space<vmem>>, vector<256x128xbf16>
    %cst_9 = arith.constant dense<0.000000e+00> : vector<8x128xf32>
    %11 = tpu.matmul %9, %10, %cst_9 {dimension_numbers = #tpu.dot_dimension_numbers<[1], [0], [0], [1], [0, 0, 1, 1], [], []>} : vector<8x256xbf16>, vector<256x128xbf16>, vector<8x128xf32> -> vector<8x128xf32>
    %12 = arith.addf %1, %11 : vector<8x128xf32>
    %c0_10 = arith.constant 0 : index
    %c256 = arith.constant 256 : index
    %13 = vector.load %arg2[%c0_10, %c256] : memref<128x1280xbf16, #tpu.memory_space<vmem>>, vector<128x256xbf16>
    %cst_11 = arith.constant dense<0.000000e+00> : vector<8x256xf32>
    %14 = tpu.matmul %0, %13, %cst_11 {dimension_numbers = #tpu.dot_dimension_numbers<[1], [0], [0], [1], [0, 0, 1, 1], [], []>} : vector<8x128xbf16>, vector<128x256xbf16>, vector<8x256xf32> -> vector<8x256xf32>
    %c0_12 = arith.constant 0 : index
    %c256_13 = arith.constant 256 : index
    %15 = vector.load %arg3[%c0_12, %c256_13] : memref<1x1280xf32, #tpu.memory_space<vmem>>, vector<1x256xf32>
    %16 = vector.broadcast %15 : vector<1x256xf32> to vector<8x256xf32>
    %17 = arith.addf %14, %16 : vector<8x256xf32>
    %cst_14 = arith.constant 0.000000e+00 : f32
    %18 = vector.broadcast %cst_14 : f32 to vector<8x256xf32>
    %19 = arith.maximumf %17, %18 : vector<8x256xf32>
    %20 = arith.truncf %19 : vector<8x256xf32> to vector<8x256xbf16>
    %c256_15 = arith.constant 256 : index
    %c0_16 = arith.constant 0 : index
    %21 = vector.load %arg4[%c256_15, %c0_16] : memref<1280x128xbf16, #tpu.memory_space<vmem>>, vector<256x128xbf16>
    %cst_17 = arith.constant dense<0.000000e+00> : vector<8x128xf32>
    %22 = tpu.matmul %20, %21, %cst_17 {dimension_numbers = #tpu.dot_dimension_numbers<[1], [0], [0], [1], [0, 0, 1, 1], [], []>} : vector<8x256xbf16>, vector<256x128xbf16>, vector<8x128xf32> -> vector<8x128xf32>
    %23 = arith.addf %12, %22 : vector<8x128xf32>
    %c0_18 = arith.constant 0 : index
    %c512 = arith.constant 512 : index
    %24 = vector.load %arg2[%c0_18, %c512] : memref<128x1280xbf16, #tpu.memory_space<vmem>>, vector<128x256xbf16>
    %cst_19 = arith.constant dense<0.000000e+00> : vector<8x256xf32>
    %25 = tpu.matmul %0, %24, %cst_19 {dimension_numbers = #tpu.dot_dimension_numbers<[1], [0], [0], [1], [0, 0, 1, 1], [], []>} : vector<8x128xbf16>, vector<128x256xbf16>, vector<8x256xf32> -> vector<8x256xf32>
    %c0_20 = arith.constant 0 : index
    %c512_21 = arith.constant 512 : index
    %26 = vector.load %arg3[%c0_20, %c512_21] : memref<1x1280xf32, #tpu.memory_space<vmem>>, vector<1x256xf32>
    %27 = vector.broadcast %26 : vector<1x256xf32> to vector<8x256xf32>
    %28 = arith.addf %25, %27 : vector<8x256xf32>
    %cst_22 = arith.constant 0.000000e+00 : f32
    %29 = vector.broadcast %cst_22 : f32 to vector<8x256xf32>
    %30 = arith.maximumf %28, %29 : vector<8x256xf32>
    %31 = arith.truncf %30 : vector<8x256xf32> to vector<8x256xbf16>
    %c512_23 = arith.constant 512 : index
    %c0_24 = arith.constant 0 : index
    %32 = vector.load %arg4[%c512_23, %c0_24] : memref<1280x128xbf16, #tpu.memory_space<vmem>>, vector<256x128xbf16>
    %cst_25 = arith.constant dense<0.000000e+00> : vector<8x128xf32>
    %33 = tpu.matmul %31, %32, %cst_25 {dimension_numbers = #tpu.dot_dimension_numbers<[1], [0], [0], [1], [0, 0, 1, 1], [], []>} : vector<8x256xbf16>, vector<256x128xbf16>, vector<8x128xf32> -> vector<8x128xf32>
    %34 = arith.addf %23, %33 : vector<8x128xf32>
    %c0_26 = arith.constant 0 : index
    %c768 = arith.constant 768 : index
    %35 = vector.load %arg2[%c0_26, %c768] : memref<128x1280xbf16, #tpu.memory_space<vmem>>, vector<128x256xbf16>
    %cst_27 = arith.constant dense<0.000000e+00> : vector<8x256xf32>
    %36 = tpu.matmul %0, %35, %cst_27 {dimension_numbers = #tpu.dot_dimension_numbers<[1], [0], [0], [1], [0, 0, 1, 1], [], []>} : vector<8x128xbf16>, vector<128x256xbf16>, vector<8x256xf32> -> vector<8x256xf32>
    %c0_28 = arith.constant 0 : index
    %c768_29 = arith.constant 768 : index
    %37 = vector.load %arg3[%c0_28, %c768_29] : memref<1x1280xf32, #tpu.memory_space<vmem>>, vector<1x256xf32>
    %38 = vector.broadcast %37 : vector<1x256xf32> to vector<8x256xf32>
    %39 = arith.addf %36, %38 : vector<8x256xf32>
    %cst_30 = arith.constant 0.000000e+00 : f32
    %40 = vector.broadcast %cst_30 : f32 to vector<8x256xf32>
    %41 = arith.maximumf %39, %40 : vector<8x256xf32>
    %42 = arith.truncf %41 : vector<8x256xf32> to vector<8x256xbf16>
    %c768_31 = arith.constant 768 : index
    %c0_32 = arith.constant 0 : index
    %43 = vector.load %arg4[%c768_31, %c0_32] : memref<1280x128xbf16, #tpu.memory_space<vmem>>, vector<256x128xbf16>
    %cst_33 = arith.constant dense<0.000000e+00> : vector<8x128xf32>
    %44 = tpu.matmul %42, %43, %cst_33 {dimension_numbers = #tpu.dot_dimension_numbers<[1], [0], [0], [1], [0, 0, 1, 1], [], []>} : vector<8x256xbf16>, vector<256x128xbf16>, vector<8x128xf32> -> vector<8x128xf32>
    %45 = arith.addf %34, %44 : vector<8x128xf32>
    %c0_34 = arith.constant 0 : index
    %c1024 = arith.constant 1024 : index
    %46 = vector.load %arg2[%c0_34, %c1024] : memref<128x1280xbf16, #tpu.memory_space<vmem>>, vector<128x256xbf16>
    %cst_35 = arith.constant dense<0.000000e+00> : vector<8x256xf32>
    %47 = tpu.matmul %0, %46, %cst_35 {dimension_numbers = #tpu.dot_dimension_numbers<[1], [0], [0], [1], [0, 0, 1, 1], [], []>} : vector<8x128xbf16>, vector<128x256xbf16>, vector<8x256xf32> -> vector<8x256xf32>
    %c0_36 = arith.constant 0 : index
    %c1024_37 = arith.constant 1024 : index
    %48 = vector.load %arg3[%c0_36, %c1024_37] : memref<1x1280xf32, #tpu.memory_space<vmem>>, vector<1x256xf32>
    %49 = vector.broadcast %48 : vector<1x256xf32> to vector<8x256xf32>
    %50 = arith.addf %47, %49 : vector<8x256xf32>
    %cst_38 = arith.constant 0.000000e+00 : f32
    %51 = vector.broadcast %cst_38 : f32 to vector<8x256xf32>
    %52 = arith.maximumf %50, %51 : vector<8x256xf32>
    %53 = arith.truncf %52 : vector<8x256xf32> to vector<8x256xbf16>
    %c1024_39 = arith.constant 1024 : index
    %c0_40 = arith.constant 0 : index
    %54 = vector.load %arg4[%c1024_39, %c0_40] : memref<1280x128xbf16, #tpu.memory_space<vmem>>, vector<256x128xbf16>
    %cst_41 = arith.constant dense<0.000000e+00> : vector<8x128xf32>
    %55 = tpu.matmul %53, %54, %cst_41 {dimension_numbers = #tpu.dot_dimension_numbers<[1], [0], [0], [1], [0, 0, 1, 1], [], []>} : vector<8x256xbf16>, vector<256x128xbf16>, vector<8x128xf32> -> vector<8x128xf32>
    %56 = arith.addf %45, %55 : vector<8x128xf32>
    %c0_42 = arith.constant 0 : index
    %c0_43 = arith.constant 0 : index
    %57 = vector.load %arg5[%c0_42, %c0_43] : memref<1x128xf32, #tpu.memory_space<vmem>>, vector<1x128xf32>
    %58 = vector.broadcast %57 : vector<1x128xf32> to vector<8x128xf32>
    %59 = arith.addf %56, %58 : vector<8x128xf32>
    %c0_44 = arith.constant 0 : index
    %c0_45 = arith.constant 0 : index
    %60 = vector.load %arg6[%c0_44, %c0_45] : memref<8x128xf32, #tpu.memory_space<vmem>>, vector<8x128xf32>
    tpu.vector_store %arg6[%c0_44, %c0_45], %59 {strides = array<i32>} : memref<8x128xf32, #tpu.memory_space<vmem>>, vector<8x128xf32>,
    return
  }
  func.func @transform_0(%arg0: i32) -> (i32, i32) {
    %c0_i32 = arith.constant 0 : i32
    %c0_i32_0 = arith.constant 0 : i32
    return %arg0, %c0_i32 : i32, i32
  }
  func.func @transform_1(%arg0: i32) -> (i32, i32) {
    %c0_i32 = arith.constant 0 : i32
    %c0_i32_0 = arith.constant 0 : i32
    %c0_i32_1 = arith.constant 0 : i32
    return %c0_i32, %c0_i32_0 : i32, i32
  }
  func.func @transform_2(%arg0: i32) -> (i32, i32) {
    %c0_i32 = arith.constant 0 : i32
    %c0_i32_0 = arith.constant 0 : i32
    %c0_i32_1 = arith.constant 0 : i32
    return %c0_i32, %c0_i32_0 : i32, i32
  }
  func.func @transform_3(%arg0: i32) -> (i32, i32) {
    %c0_i32 = arith.constant 0 : i32
    %c0_i32_0 = arith.constant 0 : i32
    %c0_i32_1 = arith.constant 0 : i32
    return %c0_i32, %c0_i32_0 : i32, i32
  }
  func.func @transform_4(%arg0: i32) -> (i32, i32) {
    %c0_i32 = arith.constant 0 : i32
    %c0_i32_0 = arith.constant 0 : i32
    %c0_i32_1 = arith.constant 0 : i32
    return %c0_i32, %c0_i32_0 : i32, i32
  }
  func.func @transform_5(%arg0: i32) -> (i32, i32) {
    %c0_i32 = arith.constant 0 : i32
    %c0_i32_0 = arith.constant 0 : i32
    return %arg0, %c0_i32 : i32, i32
  }
}

</mosaic_0001>

<bundles_post_ra>
// kernel: _forward_impl.1
= control target key start
LH: loop header
LB: loop body
LE: loop exit
PB: predicated region body
PF: predicated region fallthrough
CT: control target
= control target key end

     0   :  { %10 = vsyncpa [#allocation3], 0  ;;  %s2326_s0 = inlined_call_operand.vmem [shape: bf16[8,128], index: 0, kind: input, shape index: {}]   ;;  %s2327_s1 = inlined_call_operand.hbm [shape: bf16[128,1280], index: 1, kind: input, shape index: {}]   ;;  %s2328_s2 = inlined_call_operand.vmem [shape: f32[1,1280], index: 2, kind: input, shape index: {}]   ;;  %s2329_s3 = inlined_call_operand.hbm [shape: bf16[1280,128], index: 3, kind: input, shape index: {}]   ;;  %s2330_s4 = inlined_call_operand.vmem [shape: f32[1,128], index: 4, kind: input, shape index: {}]   ;;  %s2331_s5 = inlined_call_operand.hbm [shape: f32[8,128], index: 5, kind: output, shape index: {}]  }
   0x1   :  { %11 = vsyncpa [#allocation6], 0 }
   0x2   :  { %12 = vsyncpa [#allocation4], 0  ;;  %s2229_s18 = smov [#allocation2]  }
   0x3   :  { %s20_s19 = sshll.u32 %s2229_s18, 4  ;;  %s21_s19 = int_to_ptr.vmem [resolvable:$true] %s20_s19 }
   0x4   :  { %s2171_s20 = scalar_lea.vmem %s21_s19, 10240  ;;  %p2176_p1 = scmp.lt.s32.totalorder %s21_s19, %s21_s19 }
   0x5   :  { %p2172_p0 = scmp.ne.s32.totalorder %s21_s19, %s2171_s20  ;;  %p2177_p2 = scmp.lt.s32.totalorder %s2171_s20, %s2171_s20 }
   0x7   :  { %p2178_p3 = por %p2177_p2, %p2176_p1 }
   0x9   :  { %p2179_p4 = pnand %p2178_p3, %p2172_p0 }
   0xb   :  { %2182 = shalt.err (!%p2179_p4)
}
   0xc   :  { %s2230_s21 = smov 640   ;;  %s2231_s22 = smov 40  }
   0xd   :  { %26 = dma.hbm_to_vmem [thread:$0]  %s2327_s1, 10240, %s21_s19, [#allocation3], %s2230_s21, %s2230_s21, %s2231_s22  }
   0xe   :  { %s2232_s25 = smov [#allocation5]  }
   0xf   :  { %s34_s26 = sshll.u32 %s2232_s25, 4  ;;  %s35_s26 = int_to_ptr.vmem [resolvable:$true] %s34_s26 }
  0x10   :  { %s2191_s27 = scalar_lea.vmem %s35_s26, 10240  ;;  %p2196_p6 = scmp.lt.s32.totalorder %s35_s26, %s35_s26 }
  0x11   :  { %p2192_p5 = scmp.ne.s32.totalorder %s35_s26, %s2191_s27  ;;  %p2197_p7 = scmp.lt.s32.totalorder %s2191_s27, %s2191_s27 }
  0x13   :  { %p2198_p8 = por %p2197_p7, %p2196_p6 }
  0x15   :  { %p2199_p9 = pnand %p2198_p8, %p2192_p5 }
  0x17   :  { %2202 = shalt.err (!%p2199_p9)
}
  0x18   :  { %s2233_s28 = smov 64   ;;  %s2234_s29 = smov 4  }
  0x19   :  { %40 = dma.hbm_to_vmem [thread:$0]  %s2329_s3, 10240, %s35_s26, [#allocation6], %s2233_s28, %s2233_s28, %s2234_s29  }
  0x1a   :  { %2223 = dma.done.wait [#allocation3], 10240  }
  0x1b   :  { %2224 = vsyncadd [#allocation3], 4294957056 }
  0x1c   :  { %2225 = dma.done.wait [#allocation6], 10240  }
  0x1d   :  { %2226 = vsyncadd [#allocation6], 4294957056  ;;  %v2235_v0 = vmov 0   ;;  %v1963_v1 = vld [vmem:[#allocation2 + $0x234] ss:$40 sps:$4 sm:$0xff]   ;;  %v2019_v42 = vld [vmem:[#allocation5 + $0xe8] sm:$0xff]  }
  0x1e   :  { %191 = vmatprep.mubr.bf16.mxu0 %v2235_v0  ;;  %376 = vmatprep.mubr.bf16.mxu1 %v2235_v0  ;;  %v1965_v2 = vld [vmem:[#allocation2 + $0x23c] ss:$40 sps:$4 sm:$0xff]   ;;  %v1967_v3 = vld [vmem:[#allocation2 + $0x230] ss:$40 sps:$4 sm:$0xff]   ;;  %v1971_v6 = vld [vmem:[#allocation2 + $0x1ec] ss:$40 sps:$4 sm:$0xff]  }
  0x1f   :  { %159 = vmatprep.subr.bf16.mxu0 %v1963_v1  ;;  %v1968_v4 = vld [vmem:[#allocation2 + $0x238] ss:$40 sps:$4 sm:$0xff]   ;;  %344 = vmatprep.subr.bf16.mxu1 %v1965_v2  ;;  %v1969_v5 = vld [vmem:[#allocation2 + $0x1e4] ss:$40 sps:$4 sm:$0xff]   ;;  %v1974_v8 = vld [vmem:[#allocation2 + $0x1e8] ss:$40 sps:$4 sm:$0xff]  }
  0x20   :  { %160 = vmatpush1.bf16.msra.mxu0 %v1967_v3  ;;  %345 = vmatpush1.bf16.msra.mxu1 %v1968_v4  ;;  %v1973_v7 = vld [vmem:[#allocation2 + $0x1e0] ss:$40 sps:$4 sm:$0xff]   ;;  %v1975_v9 = vld [vmem:[#allocation2 + $0x194] ss:$40 sps:$4 sm:$0xff]   ;;  %v1979_v11 = vld [vmem:[#allocation2 + $0x190] ss:$40 sps:$4 sm:$0xff]   ;;  %v69_v4 = vlaneseq }
  0x21   :  { %161 = vmatprep.subr.bf16.mxu0 %v1969_v5  ;;  %346 = vmatprep.subr.bf16.mxu1 %v1971_v6  ;;  %v1977_v10 = vld [vmem:[#allocation2 + $0x19c] ss:$40 sps:$4 sm:$0xff]   ;;  %v1980_v12 = vld [vmem:[#allocation2 + $0x198] ss:$40 sps:$4 sm:$0xff]   ;;  %v1983_v14 = vld [vmem:[#allocation2 + $0x14c] ss:$40 sps:$4 sm:$0xff]  }
  0x22   :  { %v1981_v13 = vld [vmem:[#allocation2 + $0x144] ss:$40 sps:$4 sm:$0xff]   ;;  %v1985_v15 = vld [vmem:[#allocation2 + $0x140] ss:$40 sps:$4 sm:$0xff]   ;;  %v1987_v17 = vld [vmem:[#allocation2 + $0xf4] ss:$40 sps:$4 sm:$0xff]  }
  0x23   :  { %v1986_v16 = vld [vmem:[#allocation2 + $0x148] ss:$40 sps:$4 sm:$0xff]   ;;  %v1989_v18 = vld [vmem:[#allocation2 + $0xfc] ss:$40 sps:$4 sm:$0xff]   ;;  %v1992_v20 = vld [vmem:[#allocation2 + $0xf8] ss:$40 sps:$4 sm:$0xff]  }
  0x24   :  { %162 = vmatpush1.bf16.msra.mxu0 %v1973_v7  ;;  %347 = vmatpush1.bf16.msra.mxu1 %v1974_v8  ;;  %v1991_v19 = vld [vmem:[#allocation2 + $0xf0] ss:$40 sps:$4 sm:$0xff]   ;;  %v1993_v21 = vld [vmem:[#allocation2 + $0xa4] ss:$40 sps:$4 sm:$0xff]   ;;  %v1997_v23 = vld [vmem:[#allocation2 + $0xa0] ss:$40 sps:$4 sm:$0xff]  }
  0x25   :  { %163 = vmatprep.subr.bf16.mxu0 %v1975_v9  ;;  %348 = vmatprep.subr.bf16.mxu1 %v1977_v10  ;;  %v1995_v22 = vld [vmem:[#allocation2 + $0xac] ss:$40 sps:$4 sm:$0xff]   ;;  %v1998_v24 = vld [vmem:[#allocation2 + $0xa8] ss:$40 sps:$4 sm:$0xff]   ;;  %v2001_v26 = vld [vmem:[#allocation2 + $0x5c] ss:$40 sps:$4 sm:$0xff]  }
  0x26   :  { %v1999_v25 = vld [vmem:[#allocation2 + $0x54] ss:$40 sps:$4 sm:$0xff]   ;;  %v2003_v27 = vld [vmem:[#allocation2 + $0x50] ss:$40 sps:$4 sm:$0xff]   ;;  %v2005_v29 = vld [vmem:[#allocation2 + $0x4] ss:$40 sps:$4 sm:$0xff]  }
  0x27   :  { %v2004_v28 = vld [vmem:[#allocation2 + $0x58] ss:$40 sps:$4 sm:$0xff]   ;;  %v2007_v30 = vld [vmem:[#allocation2 + $0xc] ss:$40 sps:$4 sm:$0xff]   ;;  %v2010_v32 = vld [vmem:[#allocation2 + $0x8] ss:$40 sps:$4 sm:$0xff]  }
  0x28   :  { %164 = vmatpush1.bf16.msra.mxu0 %v1979_v11  ;;  %349 = vmatpush1.bf16.msra.mxu1 %v1980_v12  ;;  %v2009_v31 = vld [vmem:[#allocation2] ss:$40 sps:$4 sm:$0xff]   ;;  %v2011_v33 = vld [vmem:[#allocation5 + $0xf8] sm:$0xff]   ;;  %v2015_v38 = vld [vmem:[#allocation5 + $0xf0] sm:$0xff]   ;;  %v70_v5 = vshrl.u32 %v69_v4, 7  ;;  %s2236_s17 = smov [#allocation7]  }
  0x29   :  { %165 = vmatprep.subr.bf16.mxu0 %v1981_v13  ;;  %350 = vmatprep.subr.bf16.mxu1 %v1983_v14  ;;  %v2013_v34 = vld [vmem:[#allocation5 + $0x78] sm:$0xff]   ;;  %v2278_v35 = vld [vmem:[%s2326_s0] sm:$0xf]  ;;  %v2017_v39 = vld [vmem:[#allocation5 + $0x70] sm:$0xff]   ;;  %s1674_s18 = sshll.u32 %s2236_s17, 4  ;;  %s1675_s18 = int_to_ptr.vmem [resolvable:$true] %s1674_s18 }
  0x2a   :  { %v2012_v36 = vld [vmem:[#allocation5 + $0xb8] sm:$0xff]   ;;  %v2016_v40 = vld [vmem:[#allocation5 + $0xb0] sm:$0xff]   ;;  %v2021_v43 = vld [vmem:[#allocation5 + $0x68] sm:$0xff]   ;;  %v2282_v6 = vsub.s32 0, %v70_v5  ;;  %v2290_v9 = vsub.s32 1, %v70_v5  ;;  %s2203_s19 = scalar_lea.vmem %s1675_s18, 128  ;;  %p2208_p11 = scmp.lt.s32.totalorder %s1675_s18, %s1675_s18 }
  0x2b   :  { %v2014_v37 = vld [vmem:[#allocation5 + $0x38] sm:$0xff]   ;;  %v2018_v41 = vld [vmem:[#allocation5 + $0x30] sm:$0xff]   ;;  %v2020_v44 = vld [vmem:[#allocation5 + $0xa8] sm:$0xff]   ;;  %p2204_p10 = scmp.ne.s32.totalorder %s1675_s18, %s2203_s19  ;;  %p2209_p12 = scmp.lt.s32.totalorder %s2203_s19, %s2203_s19 }
  0x2c   :  { %166 = vmatpush1.bf16.msra.mxu0 %v1985_v15  ;;  %351 = vmatpush1.bf16.msra.mxu1 %v1986_v16  ;;  %v2022_v45 = vld [vmem:[#allocation5 + $0x28] sm:$0xff]   ;;  %v2023_v46 = vld [vmem:[#allocation5 + $0xe0] sm:$0xff]   ;;  %v2027_v50 = vld [vmem:[#allocation5 + $0xd8] sm:$0xff]  }
  0x2d   :  { %167 = vmatprep.subr.bf16.mxu0 %v1987_v17  ;;  %352 = vmatprep.subr.bf16.mxu1 %v1989_v18  ;;  %v2025_v47 = vld [vmem:[#allocation5 + $0x60] sm:$0xff]   ;;  %v2029_v51 = vld [vmem:[#allocation5 + $0x58] sm:$0xff]   ;;  %v2031_v54 = vld [vmem:[#allocation5 + $0xd0] sm:$0xff]   ;;  %p2210_p13 = por %p2209_p12, %p2208_p11 }
  0x2e   :  { %v2024_v48 = vld [vmem:[#allocation5 + $0xa0] sm:$0xff]   ;;  %v2028_v52 = vld [vmem:[#allocation5 + $0x98] sm:$0xff]   ;;  %v2033_v55 = vld [vmem:[#allocation5 + $0x50] sm:$0xff]  }
  0x2f   :  { %v2026_v49 = vld [vmem:[#allocation5 + $0x20] sm:$0xff]   ;;  %v2030_v53 = vld [vmem:[#allocation5 + $0x18] sm:$0xff]   ;;  %v2032_v56 = vld [vmem:[#allocation5 + $0x90] sm:$0xff]   ;;  %p2211_p0 = pnand %p2210_p13, %p2204_p10 }
  0x30   :  { %168 = vmatpush1.bf16.msra.mxu0 %v1991_v19  ;;  %353 = vmatpush1.bf16.msra.mxu1 %v1992_v20  ;;  %v2034_v57 = vld [vmem:[#allocation5 + $0x10] sm:$0xff]   ;;  %v2035_v58 = vld [vmem:[#allocation5 + $0xc8] sm:$0xff]   ;;  %v2039_v62 = vld [vmem:[#allocation5 + $0xc0] sm:$0xff]  }
  0x31   :  { %169 = vmatprep.subr.bf16.mxu0 %v1993_v21  ;;  %354 = vmatprep.subr.bf16.mxu1 %v1995_v22  ;;  %v2036_v59 = vld [vmem:[#allocation5 + $0x88] sm:$0xff]   ;;  %v2040_v63 = vld [vmem:[#allocation5 + $0x80] sm:$0xff]   ;;  %v2091_v4 = vld [vmem:[#allocation2 + $0x250] ss:$40 sps:$4 sm:$0xff]  }
  0x32   :  { %v2037_v60 = vld [vmem:[#allocation5 + $0x48] sm:$0xff]   ;;  %v2041_v1 = vld [vmem:[#allocation5 + $0x40] sm:$0xff]  }
  0x33   :  { %v2038_v61 = vld [vmem:[#allocation5 + $0x8] sm:$0xff]   ;;  %v2042_v2 = vld [vmem:[#allocation5] sm:$0xff]  }
  0x34   :  { %170 = vmatpush1.bf16.msra.mxu0 %v1997_v23  ;;  %355 = vmatpush1.bf16.msra.mxu1 %v1998_v24  ;;  %v2045_v3 = vld [vmem:[#allocation2 + $0x244] ss:$40 sps:$4 sm:$0xff]   ;;  %v67_v7 = vld [vmem:[%s2328_s2] sm:$0x3]  ;;  %v252_v8 = vld [vmem:[%s2328_s2 + $0x2] sm:$0x3] }
  0x35   :  { %171 = vmatprep.subr.bf16.mxu0 %v1999_v25  ;;  %356 = vmatprep.subr.bf16.mxu1 %v2001_v26  ;;  %v72_v10 = vrot.slane %v67_v7, %v2282_v6  ;;  %v257_v11 = vrot.slane %v252_v8, %v2282_v6  ;;  %v76_v12 = vrot.slane %v67_v7, %v2290_v9  ;;  %v2096_v5 = vld [vmem:[#allocation2 + $0x204] ss:$40 sps:$4 sm:$0xff]   ;;  %v2094_v7 = vld [vmem:[#allocation2 + $0x200] ss:$40 sps:$4 sm:$0xff]  }
  0x36   :  { %v261_v13 = vrot.slane %v252_v8, %v2290_v9  ;;  %v2099_v8 = vld [vmem:[#allocation2 + $0x1b4] ss:$40 sps:$4 sm:$0xff]  }
  0x38   :  { %172 = vmatpush1.bf16.msra.mxu0 %v2003_v27  ;;  %357 = vmatpush1.bf16.msra.mxu1 %v2004_v28 }
  0x39   :  { %173 = vmatprep.subr.bf16.mxu0 %v2005_v29  ;;  %358 = vmatprep.subr.bf16.mxu1 %v2007_v30 }
  0x3c   :  { %174 = vmatpush1.bf16.msra.mxu0 %v2009_v31  ;;  %359 = vmatpush1.bf16.msra.mxu1 %v2010_v32 }
  0x3d   :  { %1845 = vmatprep.subr.bf16.mxu0 %v2011_v33  ;;  %1867 = vmatprep.subr.bf16.mxu1 %v2013_v34  ;;  %v2043_v33 = vld [vmem:[#allocation2 + $0x240] ss:$40 sps:$4 sm:$0xff]  }
  0x3f   :  { %192 = vmatmul.mubr.bf16.vlgmr.msra.gmra.mxu0 %v2278_v35  ;;  %377 = vmatmul.mubr.bf16.vlgmr.msra.gmra.mxu1 %v2278_v35 }
  0x40   :  { %1846 = vmatpush3.bf16.msra.mxu0 %v2012_v36  ;;  %1868 = vmatpush3.bf16.msra.mxu1 %v2014_v37  ;;  %v2048_v36 = vld [vmem:[#allocation2 + $0x1f4] ss:$40 sps:$4 sm:$0xff]   ;;  %v2046_v37 = vld [vmem:[#allocation2 + $0x1f0] ss:$40 sps:$4 sm:$0xff]  }
  0x41   :  { %1847 = vmatprep.subr.bf16.mxu0 %v2015_v38  ;;  %1869 = vmatprep.subr.bf16.mxu1 %v2017_v39  ;;  %v2051_v38 = vld [vmem:[#allocation2 + $0x1a4] ss:$40 sps:$4 sm:$0xff]   ;;  %v2049_v39 = vld [vmem:[#allocation2 + $0x1a0] ss:$40 sps:$4 sm:$0xff]  }
  0x44   :  { %1848 = vmatpush3.bf16.msra.mxu0 %v2016_v40  ;;  %1870 = vmatpush3.bf16.msra.mxu1 %v2018_v41  ;;  %v2054_v40 = vld [vmem:[#allocation2 + $0x154] ss:$40 sps:$4 sm:$0xff]   ;;  %v2052_v41 = vld [vmem:[#allocation2 + $0x150] ss:$40 sps:$4 sm:$0xff]  }
  0x45   :  { %1849 = vmatprep.subr.bf16.mxu0 %v2019_v42  ;;  %1871 = vmatprep.subr.bf16.mxu1 %v2021_v43  ;;  %v2057_v42 = vld [vmem:[#allocation2 + $0x104] ss:$40 sps:$4 sm:$0xff]   ;;  %v2055_v43 = vld [vmem:[#allocation2 + $0x100] ss:$40 sps:$4 sm:$0xff]  }
  0x48   :  { %1850 = vmatpush3.bf16.msra.mxu0 %v2020_v44  ;;  %1872 = vmatpush3.bf16.msra.mxu1 %v2022_v45  ;;  %v2060_v44 = vld [vmem:[#allocation2 + $0xb4] ss:$40 sps:$4 sm:$0xff]   ;;  %v2058_v45 = vld [vmem:[#allocation2 + $0xb0] ss:$40 sps:$4 sm:$0xff]  }
  0x49   :  { %1851 = vmatprep.subr.bf16.mxu0 %v2023_v46  ;;  %1873 = vmatprep.subr.bf16.mxu1 %v2025_v47  ;;  %v2063_v46 = vld [vmem:[#allocation2 + $0x64] ss:$40 sps:$4 sm:$0xff]   ;;  %v2061_v47 = vld [vmem:[#allocation2 + $0x60] ss:$40 sps:$4 sm:$0xff]  }
  0x4c   :  { %1852 = vmatpush3.bf16.msra.mxu0 %v2024_v48  ;;  %1874 = vmatpush3.bf16.msra.mxu1 %v2026_v49  ;;  %v2066_v48 = vld [vmem:[#allocation2 + $0x14] ss:$40 sps:$4 sm:$0xff]   ;;  %v2064_v49 = vld [vmem:[#allocation2 + $0x10] ss:$40 sps:$4 sm:$0xff]  }
  0x4d   :  { %1853 = vmatprep.subr.bf16.mxu0 %v2027_v50  ;;  %1875 = vmatprep.subr.bf16.mxu1 %v2029_v51  ;;  %v2069_v50 = vld [vmem:[#allocation2 + $0x24c] ss:$40 sps:$4 sm:$0xff]   ;;  %v2067_v51 = vld [vmem:[#allocation2 + $0x248] ss:$40 sps:$4 sm:$0xff]  }
  0x50   :  { %1854 = vmatpush3.bf16.msra.mxu0 %v2028_v52  ;;  %1876 = vmatpush3.bf16.msra.mxu1 %v2030_v53  ;;  %v2072_v52 = vld [vmem:[#allocation2 + $0x1fc] ss:$40 sps:$4 sm:$0xff]   ;;  %v2070_v53 = vld [vmem:[#allocation2 + $0x1f8] ss:$40 sps:$4 sm:$0xff]  }
  0x51   :  { %1855 = vmatprep.subr.bf16.mxu0 %v2031_v54  ;;  %1877 = vmatprep.subr.bf16.mxu1 %v2033_v55  ;;  %v2075_v54 = vld [vmem:[#allocation2 + $0x1ac] ss:$40 sps:$4 sm:$0xff]   ;;  %v2073_v55 = vld [vmem:[#allocation2 + $0x1a8] ss:$40 sps:$4 sm:$0xff]  }
  0x54   :  { %1856 = vmatpush3.bf16.msra.mxu0 %v2032_v56  ;;  %1878 = vmatpush3.bf16.msra.mxu1 %v2034_v57  ;;  %v2078_v56 = vld [vmem:[#allocation2 + $0x15c] ss:$40 sps:$4 sm:$0xff]   ;;  %v2076_v57 = vld [vmem:[#allocation2 + $0x158] ss:$40 sps:$4 sm:$0xff]  }
  0x55   :  { %1857 = vmatprep.subr.bf16.mxu0 %v2035_v58  ;;  %1879 = vmatprep.subr.bf16.mxu1 %v2037_v60  ;;  %v2081_v58 = vld [vmem:[#allocation2 + $0x10c] ss:$40 sps:$4 sm:$0xff]   ;;  %v2084_v60 = vld [vmem:[#allocation2 + $0xbc] ss:$40 sps:$4 sm:$0xff]  }
  0x58   :  { %1858 = vmatpush3.bf16.msra.mxu0 %v2036_v59  ;;  %1880 = vmatpush3.bf16.msra.mxu1 %v2038_v61  ;;  %v2079_v59 = vld [vmem:[#allocation2 + $0x108] ss:$40 sps:$4 sm:$0xff]   ;;  %v2082_v61 = vld [vmem:[#allocation2 + $0xb8] ss:$40 sps:$4 sm:$0xff]  }
  0x59   :  { %1859 = vmatprep.subr.bf16.mxu0 %v2039_v62  ;;  %1881 = vmatprep.subr.bf16.mxu1 %v2041_v1  ;;  %v2087_v62 = vld [vmem:[#allocation2 + $0x6c] ss:$40 sps:$4 sm:$0xff]   ;;  %v2090_v1 = vld [vmem:[#allocation2 + $0x1c] ss:$40 sps:$4 sm:$0xff]  }
  0x5c   :  { %1860 = vmatpush3.bf16.msra.mxu0 %v2040_v63  ;;  %1882 = vmatpush3.bf16.msra.mxu1 %v2042_v2  ;;  %v2085_v63 = vld [vmem:[#allocation2 + $0x68] ss:$40 sps:$4 sm:$0xff]   ;;  %v2088_v2 = vld [vmem:[#allocation2 + $0x18] ss:$40 sps:$4 sm:$0xff]  }
  0x5d   :  { %801 = vmatprep.subr.bf16.mxu0 %v2045_v3  ;;  %v2093_v3 = vld [vmem:[#allocation2 + $0x254] ss:$40 sps:$4 sm:$0xff]  }
  0xff   :  { %v193_v14 = vpop.f32.mrf.mxu0  ;;  %v378_v15 = vpop.f32.mrf.mxu1 }
 0x100   :  { %v194_v16 = vadd.f32 %v193_v14, %v72_v10  ;;  %v379_v17 = vadd.f32 %v378_v15, %v257_v11  ;;  %v2097_v10 = vld [vmem:[#allocation2 + $0x1b0] ss:$40 sps:$4 sm:$0xff]   ;;  %v2102_v11 = vld [vmem:[#allocation2 + $0x164] ss:$40 sps:$4 sm:$0xff]   ;;  %v2100_v15 = vld [vmem:[#allocation2 + $0x160] ss:$40 sps:$4 sm:$0xff]  }
 0x101   :  { %v195_v18 = vpop.f32.mrf.mxu0  ;;  %v380_v19 = vpop.f32.mrf.mxu1  ;;  %v2117_v14 = vld [vmem:[#allocation5 + $0x170] sm:$0xff]  }
 0x102   :  { %v200_v20 = vmax.f32 %v194_v16, 0.0  ;;  %v196_v21 = vadd.f32 %v195_v18, %v76_v12  ;;  %v381_v22 = vadd.f32 %v380_v19, %v261_v13  ;;  %v385_v23 = vmax.f32 %v379_v17, 0.0  ;;  %v2115_v12 = vld [vmem:[#allocation5 + $0x178] sm:$0xff]   ;;  %v2118_v16 = vld [vmem:[#allocation5 + $0x130] sm:$0xff]   ;;  %v2119_v18 = vld [vmem:[#allocation5 + $0x168] sm:$0xff]  }
 0x103   :  { %v382_v24 = vpop.f32.mrf.mxu1  ;;  %v197_v25 = vpop.f32.mrf.mxu0  ;;  %v2116_v13 = vld [vmem:[#allocation5 + $0x138] sm:$0xff]   ;;  %1889 = vmatprep.subr.bf16.mxu1 %v2115_v12  ;;  %v2120_v19 = vld [vmem:[#allocation5 + $0x128] sm:$0xff]  }
 0x104   :  { %v201_v26 = vmax.f32 %v196_v21, 0.0  ;;  %v386_v27 = vmax.f32 %v381_v22, 0.0  ;;  %v202_v28 = vpack.c.bf16 %v200_v20, %v200_v20  ;;  %v387_v34 = vpack.c.bf16 %v385_v23, %v385_v23  ;;  %v2105_v17 = vld [vmem:[#allocation2 + $0x114] ss:$40 sps:$4 sm:$0xff]   ;;  %v2108_v20 = vld [vmem:[#allocation2 + $0xc4] ss:$40 sps:$4 sm:$0xff]  }
 0x105   :  { %v383_v29 = vpop.f32.mrf.mxu1  ;;  %v198_v30 = vpop.f32.mrf.mxu0  ;;  %v2121_v21 = vld [vmem:[#allocation5 + $0x160] sm:$0xff]   ;;  %v2111_v24 = vld [vmem:[#allocation2 + $0x74] ss:$40 sps:$4 sm:$0xff]   ;;  %v2143_v12 = vld [vmem:[#allocation5 + $0x1c8] sm:$0xff]  }
 0x106   :  { %v203_v31 = vpack.c.bf16 %v201_v26, %v201_v26  ;;  %v388_v32 = vpack.c.bf16 %v386_v27, %v386_v27  ;;  %v2106_v22 = vld [vmem:[#allocation2 + $0xc0] ss:$40 sps:$4 sm:$0xff]   ;;  %v2123_v25 = vld [vmem:[#allocation5 + $0x158] sm:$0xff]   ;;  %v2125_v29 = vld [vmem:[#allocation5 + $0x150] sm:$0xff]  }
 0x107   :  { %v2122_v23 = vld [vmem:[#allocation5 + $0x120] sm:$0xff]   ;;  %v2109_v26 = vld [vmem:[#allocation2 + $0x70] ss:$40 sps:$4 sm:$0xff]  }
 0x108   :  { %549 = vmatprep.mubr.bf16.mxu0 %v388_v32  ;;  %685 = vmatprep.mubr.bf16.mxu1 %v203_v31  ;;  %v2124_v27 = vld [vmem:[#allocation5 + $0x118] sm:$0xff]   ;;  %v2112_v30 = vld [vmem:[#allocation2 + $0x20] ss:$40 sps:$4 sm:$0xff]   ;;  %v2126_v31 = vld [vmem:[#allocation5 + $0x110] sm:$0xff]  }
 0x109   :  { %550 = vmatmul.mubr.bf16.vlgmr.msra.gmra.mxu0 %v387_v34  ;;  %686 = vmatmul.mubr.bf16.vlgmr.msra.gmra.mxu1 %v202_v28  ;;  %v2114_v28 = vld [vmem:[#allocation2 + $0x24] ss:$40 sps:$4 sm:$0xff]  }
 0x10a   :  { %802 = vmatpush1.bf16.msra.mxu0 %v2043_v33  ;;  %833 = vmatprep.mubr.bf16.mxu0 %v2235_v0  ;;  %v2127_v32 = vld [vmem:[#allocation5 + $0x148] sm:$0xff]   ;;  %v2129_v34 = vld [vmem:[#allocation5 + $0x140] sm:$0xff]  }
 0x10b   :  { %803 = vmatprep.subr.bf16.mxu0 %v2048_v36  ;;  %1890 = vmatpush3.bf16.msra.mxu1 %v2116_v13  ;;  %v2128_v33 = vld [vmem:[#allocation5 + $0x108] sm:$0xff]   ;;  %v2130_v36 = vld [vmem:[#allocation5 + $0x100] sm:$0xff]  }
 0x10c   :  { %1891 = vmatprep.subr.bf16.mxu1 %v2117_v14 }
 0x10e   :  { %804 = vmatpush1.bf16.msra.mxu0 %v2046_v37  ;;  %v2131_v37 = vld [vmem:[#allocation5 + $0x1f8] sm:$0xff]  }
 0x10f   :  { %805 = vmatprep.subr.bf16.mxu0 %v2051_v38  ;;  %1892 = vmatpush3.bf16.msra.mxu1 %v2118_v16 }
 0x110   :  { %1893 = vmatprep.subr.bf16.mxu1 %v2119_v18 }
 0x112   :  { %806 = vmatpush1.bf16.msra.mxu0 %v2049_v39 }
 0x113   :  { %807 = vmatprep.subr.bf16.mxu0 %v2054_v40  ;;  %1894 = vmatpush3.bf16.msra.mxu1 %v2120_v19 }
 0x114   :  { %1895 = vmatprep.subr.bf16.mxu1 %v2121_v21 }
 0x116   :  { %808 = vmatpush1.bf16.msra.mxu0 %v2052_v41 }
 0x117   :  { %809 = vmatprep.subr.bf16.mxu0 %v2057_v42  ;;  %1896 = vmatpush3.bf16.msra.mxu1 %v2122_v23  ;;  %v2147_v23 = vld [vmem:[#allocation5 + $0x278] sm:$0xff]  }
 0x118   :  { %1897 = vmatprep.subr.bf16.mxu1 %v2123_v25 }
 0x11a   :  { %810 = vmatpush1.bf16.msra.mxu0 %v2055_v43 }
 0x11b   :  { %811 = vmatprep.subr.bf16.mxu0 %v2060_v44  ;;  %1898 = vmatpush3.bf16.msra.mxu1 %v2124_v27  ;;  %v2148_v27 = vld [vmem:[#allocation5 + $0x238] sm:$0xff]  }
 0x11c   :  { %1899 = vmatprep.subr.bf16.mxu1 %v2125_v29  ;;  %v2149_v29 = vld [vmem:[#allocation5 + $0x270] sm:$0xff]  }
 0x11e   :  { %812 = vmatpush1.bf16.msra.mxu0 %v2058_v45 }
 0x11f   :  { %813 = vmatprep.subr.bf16.mxu0 %v2063_v46  ;;  %1900 = vmatpush3.bf16.msra.mxu1 %v2126_v31  ;;  %v2151_v31 = vld [vmem:[#allocation5 + $0x268] sm:$0xff]  }
 0x120   :  { %1901 = vmatprep.subr.bf16.mxu1 %v2127_v32  ;;  %v2152_v32 = vld [vmem:[#allocation5 + $0x228] sm:$0xff]  }
 0x122   :  { %814 = vmatpush1.bf16.msra.mxu0 %v2061_v47 }
 0x123   :  { %815 = vmatprep.subr.bf16.mxu0 %v2066_v48  ;;  %1902 = vmatpush3.bf16.msra.mxu1 %v2128_v33  ;;  %v709_v48 = vld [vmem:[%s2328_s2 + $0x4] sm:$0x3] }
 0x124   :  { %1903 = vmatprep.subr.bf16.mxu1 %v2129_v34  ;;  %v2153_v33 = vld [vmem:[#allocation5 + $0x260] sm:$0xff]  }
 0x125   :  { %v2154_v34 = vld [vmem:[#allocation5 + $0x220] sm:$0xff]  }
 0x126   :  { %816 = vmatpush1.bf16.msra.mxu0 %v2064_v49  ;;  %v714_v49 = vrot.slane %v709_v48, %v2282_v6 }
 0x127   :  { %1123 = vmatprep.subr.bf16.mxu0 %v2069_v50  ;;  %1904 = vmatpush3.bf16.msra.mxu1 %v2130_v36  ;;  %v718_v50 = vrot.slane %v709_v48, %v2290_v9  ;;  %v2155_v36 = vld [vmem:[#allocation5 + $0x258] sm:$0xff]  }
 0x128   :  { %1911 = vmatprep.subr.bf16.mxu1 %v2131_v37  ;;  %v2156_v37 = vld [vmem:[#allocation5 + $0x218] sm:$0xff]  }
 0x129   :  { %834 = vmatmul.mubr.bf16.vlgmr.msra.gmra.mxu0 %v2278_v35 }
 0x12a   :  { %1124 = vmatpush1.bf16.msra.mxu0 %v2067_v51  ;;  %1155 = vmatprep.mubr.bf16.mxu0 %v2235_v0 }
 0x12b   :  { %1125 = vmatprep.subr.bf16.mxu0 %v2072_v52 }
 0x12e   :  { %1126 = vmatpush1.bf16.msra.mxu0 %v2070_v53 }
 0x12f   :  { %1127 = vmatprep.subr.bf16.mxu0 %v2075_v54 }
 0x132   :  { %1128 = vmatpush1.bf16.msra.mxu0 %v2073_v55 }
 0x133   :  { %1129 = vmatprep.subr.bf16.mxu0 %v2078_v56 }
 0x136   :  { %1130 = vmatpush1.bf16.msra.mxu0 %v2076_v57 }
 0x137   :  { %1131 = vmatprep.subr.bf16.mxu0 %v2081_v58 }
 0x13a   :  { %1132 = vmatpush1.bf16.msra.mxu0 %v2079_v59 }
 0x13b   :  { %1133 = vmatprep.subr.bf16.mxu0 %v2084_v60  ;;  %v2132_v60 = vld [vmem:[#allocation5 + $0x1b8] sm:$0xff]  }
 0x13e   :  { %1134 = vmatpush1.bf16.msra.mxu0 %v2082_v61 }
 0x13f   :  { %1135 = vmatprep.subr.bf16.mxu0 %v2087_v62  ;;  %v2133_v62 = vld [vmem:[#allocation5 + $0x1f0] sm:$0xff]  }
 0x142   :  { %1136 = vmatpush1.bf16.msra.mxu0 %v2085_v63  ;;  %v2134_v63 = vld [vmem:[#allocation5 + $0x1b0] sm:$0xff]  }
 0x143   :  { %1137 = vmatprep.subr.bf16.mxu0 %v2090_v1  ;;  %v2135_v1 = vld [vmem:[#allocation5 + $0x1e8] sm:$0xff]  }
 0x146   :  { %1138 = vmatpush1.bf16.msra.mxu0 %v2088_v2  ;;  %v2136_v2 = vld [vmem:[#allocation5 + $0x1a8] sm:$0xff]  }
 0x147   :  { %1445 = vmatprep.subr.bf16.mxu0 %v2093_v3  ;;  %v2137_v3 = vld [vmem:[#allocation5 + $0x1e0] sm:$0xff]  }
 0x149   :  { %1156 = vmatmul.mubr.bf16.vlgmr.msra.gmra.mxu0 %v2278_v35 }
 0x14a   :  { %1446 = vmatpush1.bf16.msra.mxu0 %v2091_v4  ;;  %1477 = vmatprep.mubr.bf16.mxu0 %v2235_v0  ;;  %v2103_v0 = vld [vmem:[#allocation2 + $0x110] ss:$40 sps:$4 sm:$0xff]   ;;  %v2138_v4 = vld [vmem:[#allocation5 + $0x1a0] sm:$0xff]  }
 0x14b   :  { %1447 = vmatprep.subr.bf16.mxu0 %v2096_v5  ;;  %v2139_v5 = vld [vmem:[#allocation5 + $0x1d8] sm:$0xff]  }
 0x14e   :  { %1448 = vmatpush1.bf16.msra.mxu0 %v2094_v7  ;;  %v2140_v7 = vld [vmem:[#allocation5 + $0x198] sm:$0xff]  }
 0x14f   :  { %1449 = vmatprep.subr.bf16.mxu0 %v2099_v8  ;;  %v2141_v8 = vld [vmem:[#allocation5 + $0x1d0] sm:$0xff]  }
 0x152   :  { %1450 = vmatpush1.bf16.msra.mxu0 %v2097_v10  ;;  %v1031_v10 = vld [vmem:[%s2328_s2 + $0x6] sm:$0x3] }
 0x153   :  { %1451 = vmatprep.subr.bf16.mxu0 %v2102_v11  ;;  %v2142_v11 = vld [vmem:[#allocation5 + $0x190] sm:$0xff]   ;;  %v1036_v13 = vrot.slane %v1031_v10, %v2282_v6  ;;  %v1040_v14 = vrot.slane %v1031_v10, %v2290_v9  ;;  %v1844_v10 = vld [vmem:[%s2330_s4] ss:$0 sm:$0xff] }
 0x156   :  { %1452 = vmatpush1.bf16.msra.mxu0 %v2100_v15  ;;  %v2144_v15 = vld [vmem:[#allocation5 + $0x188] sm:$0xff]  }
 0x157   :  { %1453 = vmatprep.subr.bf16.mxu0 %v2105_v17  ;;  %v2145_v17 = vld [vmem:[#allocation5 + $0x1c0] sm:$0xff]  }
 0x15a   :  { %1454 = vmatpush1.bf16.msra.mxu0 %v2103_v0 }
 0x15b   :  { %1455 = vmatprep.subr.bf16.mxu0 %v2108_v20  ;;  %v2146_v20 = vld [vmem:[#allocation5 + $0x180] sm:$0xff]  }
 0x15e   :  { %1456 = vmatpush1.bf16.msra.mxu0 %v2106_v22 }
 0x15f   :  { %1457 = vmatprep.subr.bf16.mxu0 %v2111_v24 }
 0x162   :  { %1458 = vmatpush1.bf16.msra.mxu0 %v2109_v26 }
 0x163   :  { %1459 = vmatprep.subr.bf16.mxu0 %v2114_v28 }
 0x166   :  { %1460 = vmatpush1.bf16.msra.mxu0 %v2112_v30  ;;  %v2150_v30 = vld [vmem:[#allocation5 + $0x230] sm:$0xff]  }
 0x169   :  { %1478 = vmatmul.mubr.bf16.vlgmr.msra.gmra.mxu0 %v2278_v35 }
 0x1c9   :  { %v1861_v38 = vpop.f32.mrf.mxu0  ;;  %v1883_v39 = vpop.f32.mrf.mxu1 }
 0x1cb   :  { %v1862_v40 = vpop.f32.mrf.mxu0  ;;  %v1884_v41 = vpop.f32.mrf.mxu1 }
 0x1cc   :  { %v1863_v42 = vadd.f32 %v1862_v40, %v1861_v38  ;;  %v1885_v43 = vadd.f32 %v1884_v41, %v1883_v39  ;;  %v2157_v38 = vld [vmem:[#allocation5 + $0x250] sm:$0xff]   ;;  %v1353_v39 = vld [vmem:[%s2328_s2 + $0x8] sm:$0x3] }
 0x1cd   :  { %v1864_v44 = vpop.f32.mrf.mxu0  ;;  %v1886_v45 = vpop.f32.mrf.mxu1  ;;  %v2158_v40 = vld [vmem:[#allocation5 + $0x210] sm:$0xff]   ;;  %v2159_v41 = vld [vmem:[#allocation5 + $0x248] sm:$0xff]  }
 0x1ce   :  { %v2302_v46 = vadd.f32 %v1885_v43, %v1863_v42  ;;  %v1358_v42 = vrot.slane %v1353_v39, %v2282_v6  ;;  %v1362_v43 = vrot.slane %v1353_v39, %v2290_v9  ;;  %v2160_v44 = vld [vmem:[#allocation5 + $0x208] sm:$0xff]  }
 0x1cf   :  { %v1865_v35 = vpop.f32.mrf.mxu0  ;;  %v1887_v47 = vpop.f32.mrf.mxu1 }
 0x1d0   :  { %v2161_v35 = vld [vmem:[#allocation5 + $0x240] sm:$0xff]  }
 0x1e9   :  { %v835_v51 = vpop.f32.mrf.mxu0 }
 0x1ea   :  { %v836_v52 = vadd.f32 %v835_v51, %v714_v49 }
 0x1eb   :  { %v837_v53 = vpop.f32.mrf.mxu0 }
 0x1ec   :  { %v838_v54 = vadd.f32 %v837_v53, %v718_v50  ;;  %v842_v55 = vmax.f32 %v836_v52, 0.0  ;;  %v2162_v50 = vld [vmem:[#allocation5 + $0x200] sm:$0xff]  }
 0x1ed   :  { %v839_v56 = vpop.f32.mrf.mxu0 }
 0x1ee   :  { %v843_v57 = vmax.f32 %v838_v54, 0.0  ;;  %v844_v61 = vpack.c.bf16 %v842_v55, %v842_v55 }
 0x1ef   :  { %v840_v58 = vpop.f32.mrf.mxu0 }
 0x1f0   :  { %v845_v59 = vpack.c.bf16 %v843_v57, %v843_v57 }
 0x1f2   :  { %1006 = vmatprep.mubr.bf16.mxu1 %v845_v59 }
 0x1f3   :  { %1007 = vmatmul.mubr.bf16.vlgmr.msra.gmra.mxu1 %v844_v61 }
 0x1f4   :  { %1912 = vmatpush3.bf16.msra.mxu1 %v2132_v60 }
 0x1f5   :  { %1913 = vmatprep.subr.bf16.mxu1 %v2133_v62 }
 0x1f8   :  { %1914 = vmatpush3.bf16.msra.mxu1 %v2134_v63 }
 0x1f9   :  { %1915 = vmatprep.subr.bf16.mxu1 %v2135_v1 }
 0x1fc   :  { %1916 = vmatpush3.bf16.msra.mxu1 %v2136_v2 }
 0x1fd   :  { %1917 = vmatprep.subr.bf16.mxu1 %v2137_v3 }
 0x200   :  { %1918 = vmatpush3.bf16.msra.mxu1 %v2138_v4 }
 0x201   :  { %1919 = vmatprep.subr.bf16.mxu1 %v2139_v5 }
 0x204   :  { %1920 = vmatpush3.bf16.msra.mxu1 %v2140_v7 }
 0x205   :  { %1921 = vmatprep.subr.bf16.mxu1 %v2141_v8 }
 0x208   :  { %1922 = vmatpush3.bf16.msra.mxu1 %v2142_v11 }
 0x209   :  { %v1157_v16 = vpop.f32.mrf.mxu0  ;;  %1923 = vmatprep.subr.bf16.mxu1 %v2143_v12 }
 0x20a   :  { %v1158_v18 = vadd.f32 %v1157_v16, %v1036_v13 }
 0x20b   :  { %v1159_v0 = vpop.f32.mrf.mxu0 }
 0x20c   :  { %v1160_v19 = vadd.f32 %v1159_v0, %v1040_v14  ;;  %1924 = vmatpush3.bf16.msra.mxu1 %v2144_v15  ;;  %v1164_v21 = vmax.f32 %v1158_v18, 0.0 }
 0x20d   :  { %v1161_v22 = vpop.f32.mrf.mxu0  ;;  %1925 = vmatprep.subr.bf16.mxu1 %v2145_v17 }
 0x20e   :  { %v1165_v24 = vmax.f32 %v1160_v19, 0.0  ;;  %v1166_v28 = vpack.c.bf16 %v1164_v21, %v1164_v21 }
 0x20f   :  { %v1162_v25 = vpop.f32.mrf.mxu0 }
 0x210   :  { %v1167_v26 = vpack.c.bf16 %v1165_v24, %v1165_v24  ;;  %1926 = vmatpush3.bf16.msra.mxu1 %v2146_v20 }
 0x211   :  { %1933 = vmatprep.subr.bf16.mxu1 %v2147_v23 }
 0x212   :  { %1328 = vmatprep.mubr.bf16.mxu1 %v1167_v26 }
 0x213   :  { %1329 = vmatmul.mubr.bf16.vlgmr.msra.gmra.mxu1 %v1166_v28 }
 0x214   :  { %1934 = vmatpush3.bf16.msra.mxu1 %v2148_v27 }
 0x215   :  { %1935 = vmatprep.subr.bf16.mxu1 %v2149_v29 }
 0x218   :  { %1936 = vmatpush3.bf16.msra.mxu1 %v2150_v30 }
 0x219   :  { %1937 = vmatprep.subr.bf16.mxu1 %v2151_v31 }
 0x21c   :  { %1938 = vmatpush3.bf16.msra.mxu1 %v2152_v32 }
 0x21d   :  { %1939 = vmatprep.subr.bf16.mxu1 %v2153_v33 }
 0x220   :  { %1940 = vmatpush3.bf16.msra.mxu1 %v2154_v34 }
 0x221   :  { %1941 = vmatprep.subr.bf16.mxu1 %v2155_v36 }
 0x224   :  { %1942 = vmatpush3.bf16.msra.mxu1 %v2156_v37 }
 0x225   :  { %1943 = vmatprep.subr.bf16.mxu1 %v2157_v38 }
 0x228   :  { %1944 = vmatpush3.bf16.msra.mxu1 %v2158_v40 }
 0x229   :  { %v1479_v45 = vpop.f32.mrf.mxu0  ;;  %1945 = vmatprep.subr.bf16.mxu1 %v2159_v41 }
 0x22a   :  { %v1480_v47 = vadd.f32 %v1479_v45, %v1358_v42 }
 0x22b   :  { %v1481_v48 = vpop.f32.mrf.mxu0 }
 0x22c   :  { %v1482_v49 = vadd.f32 %v1481_v48, %v1362_v43  ;;  %1946 = vmatpush3.bf16.msra.mxu1 %v2160_v44  ;;  %v1486_v51 = vmax.f32 %v1480_v47, 0.0 }
 0x22d   :  { %v1483_v52 = vpop.f32.mrf.mxu0  ;;  %1947 = vmatprep.subr.bf16.mxu1 %v2161_v35 }
 0x22e   :  { %v1487_v53 = vmax.f32 %v1482_v49, 0.0  ;;  %v1488_v6 = vpack.c.bf16 %v1486_v51, %v1486_v51 }
 0x22f   :  { %v1484_v54 = vpop.f32.mrf.mxu0 }
 0x230   :  { %v1489_v55 = vpack.c.bf16 %v1487_v53, %v1487_v53  ;;  %1948 = vmatpush3.bf16.msra.mxu1 %v2162_v50 }
 0x232   :  { %1650 = vmatprep.mubr.bf16.mxu1 %v1489_v55 }
 0x233   :  { %1651 = vmatmul.mubr.bf16.vlgmr.msra.gmra.mxu1 %v1488_v6 }
 0x2b3   :  { %v1905_v9 = vpop.f32.mrf.mxu1 }
 0x2b5   :  { %v1906_v56 = vpop.f32.mrf.mxu1 }
 0x2b6   :  { %v1907_v63 = vadd.f32 %v1906_v56, %v1905_v9 }
 0x2b7   :  { %v1908_v57 = vpop.f32.mrf.mxu1 }
 0x2b8   :  { %v1014_v3 = vadd.f32 %v1907_v63, %v2302_v46 }
 0x2b9   :  { %v1909_v58 = vpop.f32.mrf.mxu1 }
 0x2d3   :  { %v1927_v59 = vpop.f32.mrf.mxu1 }
 0x2d5   :  { %v1928_v60 = vpop.f32.mrf.mxu1 }
 0x2d6   :  { %v1929_v1 = vadd.f32 %v1928_v60, %v1927_v59 }
 0x2d7   :  { %v1930_v61 = vpop.f32.mrf.mxu1 }
 0x2d8   :  { %v1336_v5 = vadd.f32 %v1929_v1, %v1014_v3 }
 0x2d9   :  { %v1931_v62 = vpop.f32.mrf.mxu1 }
 0x2f3   :  { %v1949_v2 = vpop.f32.mrf.mxu1 }
 0x2f5   :  { %v1950_v4 = vpop.f32.mrf.mxu1 }
 0x2f6   :  { %v1951_v7 = vadd.f32 %v1950_v4, %v1949_v2 }
 0x2f7   :  { %v1952_v8 = vpop.f32.mrf.mxu1 }
 0x2f8   :  { %v1658_v11 = vadd.f32 %v1951_v7, %v1336_v5 }
 0x2f9   :  { %v1953_v12 = vpop.f32.mrf.mxu1 }
 0x2fa   :  { %v1666_v13 = vadd.f32 %v1844_v10, %v1658_v11 }
 0x2fc   :  { %1667 = vst [vmem:[#allocation7] sm:$0xff] %v1666_v13 }
 0x2fd   :  { %2214 = shalt.err (!%p2211_p0)
}
 0x2fe   :  { %1677 = dma.vmem_to_hbm [thread:$0]  %s1675_s18, 128, %s2331_s5, [#allocation4]  }
 0x2ff   :  { %2227 = dma.done.wait [#allocation4], 128  }
 0x300   :  { %2228 = vsyncadd [#allocation4], 4294967168 }
 0x301   :  { %1681 = vsyncpa [#allocation3], 1 }
 0x302   :  { %1682 = vsyncpa [#allocation6], 1 }
 0x303   :  { %1683 = vsyncpa [#allocation4], 1 }

</bundles_post_ra>
